<compile_context>
chip_gen: v7x
topology: tpu7x:2x2x1
jax: 0.10.0
libtpu: 0.0.40
codegen_flags: <defaults>
</compile_context>

<pallas_src>
import functools

import jax
import jax.numpy as jnp
from jax.experimental import pallas as pl
from jax.experimental.pallas import tpu as pltpu


def _input_proj_kernel(x_ref, w_ref, b_ref, out_ref):
    # One MXU matmul per row tile: [TM, E] @ [E, 8H] + bias (biases folded in here,
    # so the recurrent loop never re-broadcasts them).
    out_ref[...] = (
        jnp.dot(x_ref[...], w_ref[...], preferred_element_type=jnp.float32)
        + b_ref[...]
    )


def _recurrent_head_kernel(gf_ref, gb_ref, whh_ref,
                           w1_ref, b1_ref, w2_ref, b2_ref, w3_ref, b3_ref,
                           out_ref,
                           h_ref, c_ref, s_ref,
                           *, nsteps, hidden):
    H = hidden
    t = pl.program_id(1)

    @pl.when(t == 0)
    def _():
        h_ref[...] = jnp.zeros_like(h_ref)
        c_ref[...] = jnp.zeros_like(c_ref)
        s_ref[...] = jnp.zeros_like(s_ref)

    # Fused fwd/bwd recurrent matmul: [TB, 2H] @ blockdiag(Whh_f, Whh_b) -> [TB, 8H].
    rec = jnp.dot(h_ref[...].astype(whh_ref.dtype), whh_ref[...],
                  preferred_element_type=jnp.float32)
    gates_f = gf_ref[...] + rec[:, : 4 * H]   # precomputed x@Wih_f + b_f  (streamed fwd)
    gates_b = gb_ref[...] + rec[:, 4 * H:]    # precomputed x@Wih_b + b_b  (streamed reversed)

    c = c_ref[...]

    def cell(gates, c_prev):
        # PyTorch gate order: i, f, g, o.  All gate math in f32.
        i = jax.nn.sigmoid(gates[:, 0:H])
        f = jax.nn.sigmoid(gates[:, H:2 * H])
        g = jnp.tanh(gates[:, 2 * H:3 * H])
        o = jax.nn.sigmoid(gates[:, 3 * H:4 * H])
        c_new = f * c_prev + i * g
        return o * jnp.tanh(c_new), c_new

    h_f, c_f = cell(gates_f, c[:, :H])
    h_b, c_b = cell(gates_b, c[:, H:])
    h_new = jnp.concatenate([h_f, h_b], axis=1)
    h_ref[...] = h_new
    c_ref[...] = jnp.concatenate([c_f, c_b], axis=1)
    # Running sum of per-timestep hidden states -> time mean (order-invariant, so the
    # reversed backward direction can be summed in the same pass).
    s_ref[...] = s_ref[...] + h_new

    @pl.when(t == nsteps - 1)
    def _():
        mean = s_ref[...] * (1.0 / nsteps)                       # [TB, 2H]
        # dropout1 / dropout2 are identity in eval mode.
        h1 = jnp.dot(mean.astype(w1_ref.dtype), w1_ref[...],
                     preferred_element_type=jnp.float32) + b1_ref[...]
        h1 = jnp.maximum(h1, 0.0)
        h2 = jnp.dot(h1.astype(w2_ref.dtype), w2_ref[...],
                     preferred_element_type=jnp.float32) + b2_ref[...]
        h2 = jnp.maximum(h2, 0.0)
        logits = jnp.dot(h2.astype(w3_ref.dtype), w3_ref[...],
                         preferred_element_type=jnp.float32) + b3_ref[...]
        out_ref[...] = jax.nn.sigmoid(logits)                    # lane-dense [TB, 128]


def _largest_row_tile(total_rows, target=512):
    # Largest multiple-of-8 divisor of total_rows that is <= target (total_rows % 8 == 0).
    best = 8
    d = 8
    while d <= min(total_rows, target):
        if total_rows % d == 0:
            best = d
        d += 8
    return best


def init_params(key, n_vocab, hidden_size, out_hidden, embedding_dim, n_labels):
    ks = jax.random.split(key, 16)
    H, E, O, L = hidden_size, embedding_dim, out_hidden, n_labels
    s_lstm = 1.0 / jnp.sqrt(jnp.float32(H))

    emb = jax.random.normal(ks[0], (n_vocab + 1, E), jnp.float32) * 0.1
    emb = emb.at[0].set(0.0)  # padding_idx=0

    def u(k, shape, scale):
        return jax.random.uniform(k, shape, jnp.float32, -scale, scale)

    return {
        "embedding": emb,
        # forward-direction LSTM (PyTorch layout: [4H, in])
        "w_ih_f": u(ks[1], (4 * H, E), s_lstm),
        "w_hh_f": u(ks[2], (4 * H, H), s_lstm),
        "b_ih_f": u(ks[3], (4 * H,), s_lstm),
        "b_hh_f": u(ks[4], (4 * H,), s_lstm),
        # backward-direction LSTM
        "w_ih_b": u(ks[5], (4 * H, E), s_lstm),
        "w_hh_b": u(ks[6], (4 * H, H), s_lstm),
        "b_ih_b": u(ks[7], (4 * H,), s_lstm),
        "b_hh_b": u(ks[8], (4 * H,), s_lstm),
        # MLP head (PyTorch nn.Linear layout: [out, in])
        "w1": u(ks[9], (H, 2 * H), 1.0 / jnp.sqrt(jnp.float32(2 * H))),
        "b1": u(ks[10], (H,), 1.0 / jnp.sqrt(jnp.float32(2 * H))),
        "w2": u(ks[11], (O, H), 1.0 / jnp.sqrt(jnp.float32(H))),
        "b2": u(ks[12], (O,), 1.0 / jnp.sqrt(jnp.float32(H))),
        "w3": u(ks[13], (L, O), 1.0 / jnp.sqrt(jnp.float32(O))),
        "b3": u(ks[14], (L,), 1.0 / jnp.sqrt(jnp.float32(O))),
    }


@jax.jit
def classifier_forward(x_tokens, params):
    # --- glue: embedding lookup + layout prep (plain JAX) ---
    emb = jnp.take(params["embedding"], x_tokens, axis=0)        # [B, T, E]
    B, T, E = emb.shape
    H = params["w_hh_f"].shape[1]
    O = params["w2"].shape[0]
    L = params["w3"].shape[0]
    assert (4 * H) % 128 == 0, "hidden_size must be a multiple of 32 for lane-aligned gates"

    # Pad batch to a multiple of 8 sublanes; tile by 128 when large so the batch grid
    # axis can be split across TensorCores (v7x megacore).
    B_pad = ((B + 7) // 8) * 8
    if B_pad > 128:
        B_pad = ((B_pad + 127) // 128) * 128
        TB = 128
    else:
        TB = B_pad
    nb = B_pad // TB

    emb_tm = jnp.transpose(emb, (1, 0, 2))                       # [T, B, E] time-major
    emb_tm = jnp.pad(emb_tm, ((0, 0), (0, B_pad - B), (0, 0)))
    emb_2d = emb_tm.reshape(T * B_pad, E).astype(jnp.bfloat16)   # [T*B_pad, E]

    # Hoisted input projection for both directions, biases folded in: [E, 8H].
    wih_cat = jnp.concatenate(
        [params["w_ih_f"].T, params["w_ih_b"].T], axis=1).astype(jnp.bfloat16)
    bias_cat = jnp.concatenate(
        [params["b_ih_f"] + params["b_hh_f"],
         params["b_ih_b"] + params["b_hh_b"]]).reshape(1, 8 * H).astype(jnp.float32)

    TM = _largest_row_tile(T * B_pad)
    gates = pl.pallas_call(
        _input_proj_kernel,
        out_shape=jax.ShapeDtypeStruct((T * B_pad, 8 * H), jnp.float32),
        grid_spec=pltpu.PrefetchScalarGridSpec(
            num_scalar_prefetch=0,
            grid=(T * B_pad // TM,),
            in_specs=[pl.BlockSpec((TM, E), lambda i: (i, 0)),
                      pl.BlockSpec((E, 8 * H), lambda i: (0, 0)),
                      pl.BlockSpec((1, 8 * H), lambda i: (0, 0))],
            out_specs=pl.BlockSpec((TM, 8 * H), lambda i: (i, 0))),
        compiler_params=pltpu.CompilerParams(dimension_semantics=("parallel",)),
    )(emb_2d, wih_cat, bias_cat)

    # Block-diagonal recurrent weight: [[Whh_f, 0], [0, Whh_b]] -> [2H, 8H].
    zeros_h = jnp.zeros((H, 4 * H), jnp.float32)
    whh_bd = jnp.concatenate(
        [jnp.concatenate([params["w_hh_f"].T, zeros_h], axis=1),
         jnp.concatenate([zeros_h, params["w_hh_b"].T], axis=1)],
        axis=0).astype(jnp.bfloat16)

    # MLP head weights ([in, out]); last layer padded to 128 lanes for lane-dense stores.
    L_pad = max(128, ((L + 127) // 128) * 128)
    w1 = params["w1"].T.astype(jnp.bfloat16)                     # [2H, H]
    b1 = params["b1"].reshape(1, H).astype(jnp.float32)
    w2 = params["w2"].T.astype(jnp.bfloat16)                     # [H, O]
    b2 = params["b2"].reshape(1, O).astype(jnp.float32)
    w3 = jnp.pad(params["w3"].T, ((0, 0), (0, L_pad - L))).astype(jnp.bfloat16)   # [O, L_pad]
    b3 = jnp.pad(params["b3"], ((0, L_pad - L),)).reshape(1, L_pad).astype(jnp.float32)

    kernel = functools.partial(_recurrent_head_kernel, nsteps=T, hidden=H)
    out_pad = pl.pallas_call(
        kernel,
        out_shape=jax.ShapeDtypeStruct((B_pad, L_pad), jnp.float32),
        grid_spec=pltpu.PrefetchScalarGridSpec(
            num_scalar_prefetch=0,
            grid=(nb, T),
            in_specs=[
                # same precomputed-gates array fed twice: forward order and reversed order
                pl.BlockSpec((TB, 4 * H), lambda b, t: (t * nb + b, 0)),
                pl.BlockSpec((TB, 4 * H), lambda b, t: ((T - 1 - t) * nb + b, 1)),
                pl.BlockSpec((2 * H, 8 * H), lambda b, t: (0, 0)),
                pl.BlockSpec((2 * H, H), lambda b, t: (0, 0)),
                pl.BlockSpec((1, H), lambda b, t: (0, 0)),
                pl.BlockSpec((H, O), lambda b, t: (0, 0)),
                pl.BlockSpec((1, O), lambda b, t: (0, 0)),
                pl.BlockSpec((O, L_pad), lambda b, t: (0, 0)),
                pl.BlockSpec((1, L_pad), lambda b, t: (0, 0)),
            ],
            out_specs=pl.BlockSpec((TB, L_pad), lambda b, t: (b, 0)),
            scratch_shapes=[pltpu.VMEM((TB, 2 * H), jnp.float32),   # h (fwd|bwd)
                            pltpu.VMEM((TB, 2 * H), jnp.float32),   # c (fwd|bwd)
                            pltpu.VMEM((TB, 2 * H), jnp.float32)]), # running sum
        compiler_params=pltpu.CompilerParams(
            dimension_semantics=("parallel", "arbitrary")),
    )(gates, gates, whh_bd, w1, b1, w2, b2, w3, b3)

    return out_pad[:B, :L].reshape(-1)   # drop batch/label padding, then .flatten()


if __name__ == "__main__":
    # Small, module-consistent shapes.
    n_vocab, hidden_size, out_hidden, embedding_dim, n_labels, max_seq = 50, 32, 16, 32, 4, 8
    batch = 2

    key = jax.random.PRNGKey(0)
    k_param, k_tok = jax.random.split(key)
    params = init_params(k_param, n_vocab, hidden_size, out_hidden, embedding_dim, n_labels)

    x = jax.random.randint(k_tok, (batch, max_seq), 0, n_vocab + 1, dtype=jnp.int32)

    out = classifier_forward(x, params)
    jax.block_until_ready(out)
    assert out.shape == (batch * n_labels,)
    print("KERNEL_OK")
</pallas_src>

<mosaic_0001>
module attributes {stable_mosaic.version = 11 : i64} {
  func.func @_input_proj_kernel(%arg0: i32, %arg1: memref<64x32xbf16, #tpu.memory_space<vmem>>, %arg2: memref<32x256xbf16, #tpu.memory_space<vmem>>, %arg3: memref<1x256xf32, #tpu.memory_space<vmem>>, %arg4: memref<64x256xf32, #tpu.memory_space<vmem>>) attributes {dimension_semantics = [#tpu.dimension_semantics<parallel>], iteration_bounds = array<i64: 1>, scalar_prefetch = 0 : i64, scratch_operands = 0 : i64, tpu.core_type = #tpu.core_type<tc>, window_params = [{transform_indices = @transform_0, window_bounds = array<i64: 64, 32>}, {pipeline_mode = #tpu.pipeline_mode<synchronous>, transform_indices = @transform_1, window_bounds = array<i64: 32, 256>}, {pipeline_mode = #tpu.pipeline_mode<synchronous>, transform_indices = @transform_2, window_bounds = array<i64: 1, 256>}, {transform_indices = @transform_3, window_bounds = array<i64: 64, 256>}]} {
    %c0 = arith.constant 0 : index
    %c0_0 = arith.constant 0 : index
    %0 = vector.load %arg1[%c0, %c0_0] : memref<64x32xbf16, #tpu.memory_space<vmem>>, vector<64x32xbf16>
    %c0_1 = arith.constant 0 : index
    %c0_2 = arith.constant 0 : index
    %1 = vector.load %arg2[%c0_1, %c0_2] : memref<32x256xbf16, #tpu.memory_space<vmem>>, vector<32x256xbf16>
    %cst = arith.constant dense<0.000000e+00> : vector<64x256xf32>
    %2 = tpu.matmul %0, %1, %cst {dimension_numbers = #tpu.dot_dimension_numbers<[1], [0], [0], [1], [0, 0, 1, 1], [], []>} : vector<64x32xbf16>, vector<32x256xbf16>, vector<64x256xf32> -> vector<64x256xf32>
    %c0_3 = arith.constant 0 : index
    %c0_4 = arith.constant 0 : index
    %3 = vector.load %arg3[%c0_3, %c0_4] : memref<1x256xf32, #tpu.memory_space<vmem>>, vector<1x256xf32>
    %4 = vector.broadcast %3 : vector<1x256xf32> to vector<64x256xf32>
    %5 = arith.addf %2, %4 : vector<64x256xf32>
    %c0_5 = arith.constant 0 : index
    %c0_6 = arith.constant 0 : index
    %6 = vector.load %arg4[%c0_5, %c0_6] : memref<64x256xf32, #tpu.memory_space<vmem>>, vector<64x256xf32>
    tpu.vector_store %arg4[%c0_5, %c0_6], %5 {strides = array<i32>} : memref<64x256xf32, #tpu.memory_space<vmem>>, vector<64x256xf32>,
    return
  }
  func.func @transform_0(%arg0: i32) -> (i32, i32) {
    %c0_i32 = arith.constant 0 : i32
    %c0_i32_0 = arith.constant 0 : i32
    return %arg0, %c0_i32 : i32, i32
  }
  func.func @transform_1(%arg0: i32) -> (i32, i32) {
    %c0_i32 = arith.constant 0 : i32
    %c0_i32_0 = arith.constant 0 : i32
    %c0_i32_1 = arith.constant 0 : i32
    return %c0_i32, %c0_i32_0 : i32, i32
  }
  func.func @transform_2(%arg0: i32) -> (i32, i32) {
    %c0_i32 = arith.constant 0 : i32
    %c0_i32_0 = arith.constant 0 : i32
    %c0_i32_1 = arith.constant 0 : i32
    return %c0_i32, %c0_i32_0 : i32, i32
  }
  func.func @transform_3(%arg0: i32) -> (i32, i32) {
    %c0_i32 = arith.constant 0 : i32
    %c0_i32_0 = arith.constant 0 : i32
    return %arg0, %c0_i32 : i32, i32
  }
}

module attributes {stable_mosaic.version = 11 : i64} {
  func.func @_recurrent_head_kernel(%arg0: i32, %arg1: i32, %arg2: memref<8x128xf32, #tpu.memory_space<vmem>>, %arg3: memref<8x128xf32, #tpu.memory_space<vmem>>, %arg4: memref<64x256xbf16, #tpu.memory_space<vmem>>, %arg5: memref<64x32xbf16, #tpu.memory_space<vmem>>, %arg6: memref<1x32xf32, #tpu.memory_space<vmem>>, %arg7: memref<32x16xbf16, #tpu.memory_space<vmem>>, %arg8: memref<1x16xf32, #tpu.memory_space<vmem>>, %arg9: memref<16x128xbf16, #tpu.memory_space<vmem>>, %arg10: memref<1x128xf32, #tpu.memory_space<vmem>>, %arg11: memref<8x128xf32, #tpu.memory_space<vmem>>, %arg12: memref<8x64xf32, #tpu.memory_space<vmem>>, %arg13: memref<8x64xf32, #tpu.memory_space<vmem>>, %arg14: memref<8x64xf32, #tpu.memory_space<vmem>>) attributes {dimension_semantics = [#tpu.dimension_semantics<parallel>, #tpu.dimension_semantics<arbitrary>], iteration_bounds = array<i64: 1, 8>, scalar_prefetch = 0 : i64, scratch_operands = 3 : i64, tpu.core_type = #tpu.core_type<tc>, window_params = [{transform_indices = @transform_0, window_bounds = array<i64: 8, 128>}, {transform_indices = @transform_1, window_bounds = array<i64: 8, 128>}, {pipeline_mode = #tpu.pipeline_mode<synchronous>, transform_indices = @transform_2, window_bounds = array<i64: 64, 256>}, {pipeline_mode = #tpu.pipeline_mode<synchronous>, transform_indices = @transform_3, window_bounds = array<i64: 64, 32>}, {pipeline_mode = #tpu.pipeline_mode<synchronous>, transform_indices = @transform_4, window_bounds = array<i64: 1, 32>}, {pipeline_mode = #tpu.pipeline_mode<synchronous>, transform_indices = @transform_5, window_bounds = array<i64: 32, 16>}, {pipeline_mode = #tpu.pipeline_mode<synchronous>, transform_indices = @transform_6, window_bounds = array<i64: 1, 16>}, {pipeline_mode = #tpu.pipeline_mode<synchronous>, transform_indices = @transform_7, window_bounds = array<i64: 16, 128>}, {pipeline_mode = #tpu.pipeline_mode<synchronous>, transform_indices = @transform_8, window_bounds = array<i64: 1, 128>}, {transform_indices = @transform_9, window_bounds = array<i64: 8, 128>}]} {
    %c0_i32 = arith.constant 0 : i32
    %0 = arith.cmpi eq, %arg1, %c0_i32 : i32
    %1 = arith.extui %0 : i1 to i32
    %c0_i32_0 = arith.constant 0 : i32
    %2 = arith.cmpi ne, %1, %c0_i32_0 : i32
    scf.if %2 {
      %cst_25 = arith.constant 0.000000e+00 : f32
      %76 = vector.broadcast %cst_25 : f32 to vector<8x64xf32>
      %c0_26 = arith.constant 0 : index
      %c0_27 = arith.constant 0 : index
      %77 = vector.load %arg12[%c0_26, %c0_27] : memref<8x64xf32, #tpu.memory_space<vmem>>, vector<8x64xf32>
      tpu.vector_store %arg12[%c0_26, %c0_27], %76 {strides = array<i32>} : memref<8x64xf32, #tpu.memory_space<vmem>>, vector<8x64xf32>,
      %cst_28 = arith.constant 0.000000e+00 : f32
      %78 = vector.broadcast %cst_28 : f32 to vector<8x64xf32>
      %c0_29 = arith.constant 0 : index
      %c0_30 = arith.constant 0 : index
      %79 = vector.load %arg13[%c0_29, %c0_30] : memref<8x64xf32, #tpu.memory_space<vmem>>, vector<8x64xf32>
      tpu.vector_store %arg13[%c0_29, %c0_30], %78 {strides = array<i32>} : memref<8x64xf32, #tpu.memory_space<vmem>>, vector<8x64xf32>,
      %cst_31 = arith.constant 0.000000e+00 : f32
      %80 = vector.broadcast %cst_31 : f32 to vector<8x64xf32>
      %c0_32 = arith.constant 0 : index
      %c0_33 = arith.constant 0 : index
      %81 = vector.load %arg14[%c0_32, %c0_33] : memref<8x64xf32, #tpu.memory_space<vmem>>, vector<8x64xf32>
      tpu.vector_store %arg14[%c0_32, %c0_33], %80 {strides = array<i32>} : memref<8x64xf32, #tpu.memory_space<vmem>>, vector<8x64xf32>,
    } else {
    }
    %c0 = arith.constant 0 : index
    %c0_1 = arith.constant 0 : index
    %3 = vector.load %arg12[%c0, %c0_1] : memref<8x64xf32, #tpu.memory_space<vmem>>, vector<8x64xf32>
    %4 = arith.truncf %3 : vector<8x64xf32> to vector<8x64xbf16>
    %c0_2 = arith.constant 0 : index
    %c0_3 = arith.constant 0 : index
    %5 = vector.load %arg4[%c0_2, %c0_3] : memref<64x256xbf16, #tpu.memory_space<vmem>>, vector<64x256xbf16>
    %cst = arith.constant dense<0.000000e+00> : vector<8x256xf32>
    %6 = tpu.matmul %4, %5, %cst {dimension_numbers = #tpu.dot_dimension_numbers<[1], [0], [0], [1], [0, 0, 1, 1], [], []>} : vector<8x64xbf16>, vector<64x256xbf16>, vector<8x256xf32> -> vector<8x256xf32>
    %c0_4 = arith.constant 0 : index
    %c0_5 = arith.constant 0 : index
    %7 = vector.load %arg2[%c0_4, %c0_5] : memref<8x128xf32, #tpu.memory_space<vmem>>, vector<8x128xf32>
    %8 = vector.extract_strided_slice %6 {offsets = [0, 0], sizes = [8, 128], strides = [1, 1]} : vector<8x256xf32> to vector<8x128xf32>
    %9 = arith.addf %7, %8 : vector<8x128xf32>
    %c0_6 = arith.constant 0 : index
    %c0_7 = arith.constant 0 : index
    %10 = vector.load %arg3[%c0_6, %c0_7] : memref<8x128xf32, #tpu.memory_space<vmem>>, vector<8x128xf32>
    %11 = vector.extract_strided_slice %6 {offsets = [0, 128], sizes = [8, 128], strides = [1, 1]} : vector<8x256xf32> to vector<8x128xf32>
    %12 = arith.addf %10, %11 : vector<8x128xf32>
    %c0_8 = arith.constant 0 : index
    %c0_9 = arith.constant 0 : index
    %13 = vector.load %arg13[%c0_8, %c0_9] : memref<8x64xf32, #tpu.memory_space<vmem>>, vector<8x64xf32>
    %14 = vector.extract_strided_slice %13 {offsets = [0, 0], sizes = [8, 32], strides = [1, 1]} : vector<8x64xf32> to vector<8x32xf32>
    %15 = vector.extract_strided_slice %9 {offsets = [0, 0], sizes = [8, 32], strides = [1, 1]} : vector<8x128xf32> to vector<8x32xf32>
    %16 = arith.negf %15 : vector<8x32xf32>
    %17 = math.exp %16 : vector<8x32xf32>
    %cst_10 = arith.constant 1.000000e+00 : f32
    %18 = vector.broadcast %cst_10 : f32 to vector<8x32xf32>
    %19 = arith.addf %18, %17 : vector<8x32xf32>
    %20 = arith.divf %18, %19 : vector<8x32xf32>
    %21 = vector.extract_strided_slice %9 {offsets = [0, 32], sizes = [8, 32], strides = [1, 1]} : vector<8x128xf32> to vector<8x32xf32>
    %22 = arith.negf %21 : vector<8x32xf32>
    %23 = math.exp %22 : vector<8x32xf32>
    %cst_11 = arith.constant 1.000000e+00 : f32
    %24 = vector.broadcast %cst_11 : f32 to vector<8x32xf32>
    %25 = arith.addf %24, %23 : vector<8x32xf32>
    %26 = arith.divf %24, %25 : vector<8x32xf32>
    %27 = vector.extract_strided_slice %9 {offsets = [0, 64], sizes = [8, 32], strides = [1, 1]} : vector<8x128xf32> to vector<8x32xf32>
    %28 = math.tanh %27 : vector<8x32xf32>
    %29 = vector.extract_strided_slice %9 {offsets = [0, 96], sizes = [8, 32], strides = [1, 1]} : vector<8x128xf32> to vector<8x32xf32>
    %30 = arith.negf %29 : vector<8x32xf32>
    %31 = math.exp %30 : vector<8x32xf32>
    %cst_12 = arith.constant 1.000000e+00 : f32
    %32 = vector.broadcast %cst_12 : f32 to vector<8x32xf32>
    %33 = arith.addf %32, %31 : vector<8x32xf32>
    %34 = arith.divf %32, %33 : vector<8x32xf32>
    %35 = arith.mulf %26, %14 : vector<8x32xf32>
    %36 = arith.mulf %20, %28 : vector<8x32xf32>
    %37 = arith.addf %35, %36 : vector<8x32xf32>
    %38 = math.tanh %37 : vector<8x32xf32>
    %39 = arith.mulf %34, %38 : vector<8x32xf32>
    %40 = vector.extract_strided_slice %13 {offsets = [0, 32], sizes = [8, 32], strides = [1, 1]} : vector<8x64xf32> to vector<8x32xf32>
    %41 = vector.extract_strided_slice %12 {offsets = [0, 0], sizes = [8, 32], strides = [1, 1]} : vector<8x128xf32> to vector<8x32xf32>
    %42 = arith.negf %41 : vector<8x32xf32>
    %43 = math.exp %42 : vector<8x32xf32>
    %cst_13 = arith.constant 1.000000e+00 : f32
    %44 = vector.broadcast %cst_13 : f32 to vector<8x32xf32>
    %45 = arith.addf %44, %43 : vector<8x32xf32>
    %46 = arith.divf %44, %45 : vector<8x32xf32>
    %47 = vector.extract_strided_slice %12 {offsets = [0, 32], sizes = [8, 32], strides = [1, 1]} : vector<8x128xf32> to vector<8x32xf32>
    %48 = arith.negf %47 : vector<8x32xf32>
    %49 = math.exp %48 : vector<8x32xf32>
    %cst_14 = arith.constant 1.000000e+00 : f32
    %50 = vector.broadcast %cst_14 : f32 to vector<8x32xf32>
    %51 = arith.addf %50, %49 : vector<8x32xf32>
    %52 = arith.divf %50, %51 : vector<8x32xf32>
    %53 = vector.extract_strided_slice %12 {offsets = [0, 64], sizes = [8, 32], strides = [1, 1]} : vector<8x128xf32> to vector<8x32xf32>
    %54 = math.tanh %53 : vector<8x32xf32>
    %55 = vector.extract_strided_slice %12 {offsets = [0, 96], sizes = [8, 32], strides = [1, 1]} : vector<8x128xf32> to vector<8x32xf32>
    %56 = arith.negf %55 : vector<8x32xf32>
    %57 = math.exp %56 : vector<8x32xf32>
    %cst_15 = arith.constant 1.000000e+00 : f32
    %58 = vector.broadcast %cst_15 : f32 to vector<8x32xf32>
    %59 = arith.addf %58, %57 : vector<8x32xf32>
    %60 = arith.divf %58, %59 : vector<8x32xf32>
    %61 = arith.mulf %52, %40 : vector<8x32xf32>
    %62 = arith.mulf %46, %54 : vector<8x32xf32>
    %63 = arith.addf %61, %62 : vector<8x32xf32>
    %64 = math.tanh %63 : vector<8x32xf32>
    %65 = arith.mulf %60, %64 : vector<8x32xf32>
    %66 = tpu.concatenate %39, %65 in 1 : vector<8x32xf32>, vector<8x32xf32> -> vector<8x64xf32>
    %c0_16 = arith.constant 0 : index
    %c0_17 = arith.constant 0 : index
    %67 = vector.load %arg12[%c0_16, %c0_17] : memref<8x64xf32, #tpu.memory_space<vmem>>, vector<8x64xf32>
    tpu.vector_store %arg12[%c0_16, %c0_17], %66 {strides = array<i32>} : memref<8x64xf32, #tpu.memory_space<vmem>>, vector<8x64xf32>,
    %68 = tpu.concatenate %37, %63 in 1 : vector<8x32xf32>, vector<8x32xf32> -> vector<8x64xf32>
    %c0_18 = arith.constant 0 : index
    %c0_19 = arith.constant 0 : index
    %69 = vector.load %arg13[%c0_18, %c0_19] : memref<8x64xf32, #tpu.memory_space<vmem>>, vector<8x64xf32>
    tpu.vector_store %arg13[%c0_18, %c0_19], %68 {strides = array<i32>} : memref<8x64xf32, #tpu.memory_space<vmem>>, vector<8x64xf32>,
    %c0_20 = arith.constant 0 : index
    %c0_21 = arith.constant 0 : index
    %70 = vector.load %arg14[%c0_20, %c0_21] : memref<8x64xf32, #tpu.memory_space<vmem>>, vector<8x64xf32>
    %71 = arith.addf %70, %66 : vector<8x64xf32>
    %c0_22 = arith.constant 0 : index
    %c0_23 = arith.constant 0 : index
    %72 = vector.load %arg14[%c0_22, %c0_23] : memref<8x64xf32, #tpu.memory_space<vmem>>, vector<8x64xf32>
    tpu.vector_store %arg14[%c0_22, %c0_23], %71 {strides = array<i32>} : memref<8x64xf32, #tpu.memory_space<vmem>>, vector<8x64xf32>,
    %c7_i32 = arith.constant 7 : i32
    %73 = arith.cmpi eq, %arg1, %c7_i32 : i32
    %74 = arith.extui %73 : i1 to i32
    %c0_i32_24 = arith.constant 0 : i32
    %75 = arith.cmpi ne, %74, %c0_i32_24 : i32
    scf.if %75 {
      %c0_25 = arith.constant 0 : index
      %c0_26 = arith.constant 0 : index
      %76 = vector.load %arg14[%c0_25, %c0_26] : memref<8x64xf32, #tpu.memory_space<vmem>>, vector<8x64xf32>
      %cst_27 = arith.constant 1.250000e-01 : f32
      %77 = vector.broadcast %cst_27 : f32 to vector<8x64xf32>
      %78 = arith.mulf %76, %77 : vector<8x64xf32>
      %79 = arith.truncf %78 : vector<8x64xf32> to vector<8x64xbf16>
      %c0_28 = arith.constant 0 : index
      %c0_29 = arith.constant 0 : index
      %80 = vector.load %arg5[%c0_28, %c0_29] : memref<64x32xbf16, #tpu.memory_space<vmem>>, vector<64x32xbf16>
      %cst_30 = arith.constant dense<0.000000e+00> : vector<8x32xf32>
      %81 = tpu.matmul %79, %80, %cst_30 {dimension_numbers = #tpu.dot_dimension_numbers<[1], [0], [0], [1], [0, 0, 1, 1], [], []>} : vector<8x64xbf16>, vector<64x32xbf16>, vector<8x32xf32> -> vector<8x32xf32>
      %c0_31 = arith.constant 0 : index
      %c0_32 = arith.constant 0 : index
      %82 = vector.load %arg6[%c0_31, %c0_32] : memref<1x32xf32, #tpu.memory_space<vmem>>, vector<1x32xf32>
      %83 = vector.broadcast %82 : vector<1x32xf32> to vector<8x32xf32>
      %84 = arith.addf %81, %83 : vector<8x32xf32>
      %cst_33 = arith.constant 0.000000e+00 : f32
      %85 = vector.broadcast %cst_33 : f32 to vector<8x32xf32>
      %86 = arith.maximumf %84, %85 : vector<8x32xf32>
      %87 = arith.truncf %86 : vector<8x32xf32> to vector<8x32xbf16>
      %c0_34 = arith.constant 0 : index
      %c0_35 = arith.constant 0 : index
      %88 = vector.load %arg7[%c0_34, %c0_35] : memref<32x16xbf16, #tpu.memory_space<vmem>>, vector<32x16xbf16>
      %cst_36 = arith.constant dense<0.000000e+00> : vector<8x16xf32>
      %89 = tpu.matmul %87, %88, %cst_36 {dimension_numbers = #tpu.dot_dimension_numbers<[1], [0], [0], [1], [0, 0, 1, 1], [], []>} : vector<8x32xbf16>, vector<32x16xbf16>, vector<8x16xf32> -> vector<8x16xf32>
      %c0_37 = arith.constant 0 : index
      %c0_38 = arith.constant 0 : index
      %90 = vector.load %arg8[%c0_37, %c0_38] : memref<1x16xf32, #tpu.memory_space<vmem>>, vector<1x16xf32>
      %91 = vector.broadcast %90 : vector<1x16xf32> to vector<8x16xf32>
      %92 = arith.addf %89, %91 : vector<8x16xf32>
      %cst_39 = arith.constant 0.000000e+00 : f32
      %93 = vector.broadcast %cst_39 : f32 to vector<8x16xf32>
      %94 = arith.maximumf %92, %93 : vector<8x16xf32>
      %95 = arith.truncf %94 : vector<8x16xf32> to vector<8x16xbf16>
      %c0_40 = arith.constant 0 : index
      %c0_41 = arith.constant 0 : index
      %96 = vector.load %arg9[%c0_40, %c0_41] : memref<16x128xbf16, #tpu.memory_space<vmem>>, vector<16x128xbf16>
      %cst_42 = arith.constant dense<0.000000e+00> : vector<8x128xf32>
      %97 = tpu.matmul %95, %96, %cst_42 {dimension_numbers = #tpu.dot_dimension_numbers<[1], [0], [0], [1], [0, 0, 1, 1], [], []>} : vector<8x16xbf16>, vector<16x128xbf16>, vector<8x128xf32> -> vector<8x128xf32>
      %c0_43 = arith.constant 0 : index
      %c0_44 = arith.constant 0 : index
      %98 = vector.load %arg10[%c0_43, %c0_44] : memref<1x128xf32, #tpu.memory_space<vmem>>, vector<1x128xf32>
      %99 = vector.broadcast %98 : vector<1x128xf32> to vector<8x128xf32>
      %100 = arith.addf %97, %99 : vector<8x128xf32>
      %101 = arith.negf %100 : vector<8x128xf32>
      %102 = math.exp %101 : vector<8x128xf32>
      %cst_45 = arith.constant 1.000000e+00 : f32
      %103 = vector.broadcast %cst_45 : f32 to vector<8x128xf32>
      %104 = arith.addf %103, %102 : vector<8x128xf32>
      %105 = arith.divf %103, %104 : vector<8x128xf32>
      %c0_46 = arith.constant 0 : index
      %c0_47 = arith.constant 0 : index
      %106 = vector.load %arg11[%c0_46, %c0_47] : memref<8x128xf32, #tpu.memory_space<vmem>>, vector<8x128xf32>
      tpu.vector_store %arg11[%c0_46, %c0_47], %105 {strides = array<i32>} : memref<8x128xf32, #tpu.memory_space<vmem>>, vector<8x128xf32>,
    } else {
    }
    return
  }
  func.func @transform_0(%arg0: i32, %arg1: i32) -> (i32, i32) {
    %c1_i32 = arith.constant 1 : i32
    %0 = arith.muli %arg1, %c1_i32 : i32
    %1 = arith.addi %0, %arg0 : i32
    %c0_i32 = arith.constant 0 : i32
    %c0_i32_0 = arith.constant 0 : i32
    return %1, %c0_i32 : i32, i32
  }
  func.func @transform_1(%arg0: i32, %arg1: i32) -> (i32, i32) {
    %c7_i32 = arith.constant 7 : i32
    %0 = arith.subi %c7_i32, %arg1 : i32
    %c1_i32 = arith.constant 1 : i32
    %1 = arith.muli %0, %c1_i32 : i32
    %2 = arith.addi %1, %arg0 : i32
    %c1_i32_0 = arith.constant 1 : i32
    %c0_i32 = arith.constant 0 : i32
    return %2, %c1_i32_0 : i32, i32
  }
  func.func @transform_2(%arg0: i32, %arg1: i32) -> (i32, i32) {
    %c0_i32 = arith.constant 0 : i32
    %c0_i32_0 = arith.constant 0 : i32
    %c0_i32_1 = arith.constant 0 : i32
    return %c0_i32, %c0_i32_0 : i32, i32
  }
  func.func @transform_3(%arg0: i32, %arg1: i32) -> (i32, i32) {
    %c0_i32 = arith.constant 0 : i32
    %c0_i32_0 = arith.constant 0 : i32
    %c0_i32_1 = arith.constant 0 : i32
    return %c0_i32, %c0_i32_0 : i32, i32
  }
  func.func @transform_4(%arg0: i32, %arg1: i32) -> (i32, i32) {
    %c0_i32 = arith.constant 0 : i32
    %c0_i32_0 = arith.constant 0 : i32
    %c0_i32_1 = arith.constant 0 : i32
    return %c0_i32, %c0_i32_0 : i32, i32
  }
  func.func @transform_5(%arg0: i32, %arg1: i32) -> (i32, i32) {
    %c0_i32 = arith.constant 0 : i32
    %c0_i32_0 = arith.constant 0 : i32
    %c0_i32_1 = arith.constant 0 : i32
    return %c0_i32, %c0_i32_0 : i32, i32
  }
  func.func @transform_6(%arg0: i32, %arg1: i32) -> (i32, i32) {
    %c0_i32 = arith.constant 0 : i32
    %c0_i32_0 = arith.constant 0 : i32
    %c0_i32_1 = arith.constant 0 : i32
    return %c0_i32, %c0_i32_0 : i32, i32
  }
  func.func @transform_7(%arg0: i32, %arg1: i32) -> (i32, i32) {
    %c0_i32 = arith.constant 0 : i32
    %c0_i32_0 = arith.constant 0 : i32
    %c0_i32_1 = arith.constant 0 : i32
    return %c0_i32, %c0_i32_0 : i32, i32
  }
  func.func @transform_8(%arg0: i32, %arg1: i32) -> (i32, i32) {
    %c0_i32 = arith.constant 0 : i32
    %c0_i32_0 = arith.constant 0 : i32
    %c0_i32_1 = arith.constant 0 : i32
    return %c0_i32, %c0_i32_0 : i32, i32
  }
  func.func @transform_9(%arg0: i32, %arg1: i32) -> (i32, i32) {
    %c0_i32 = arith.constant 0 : i32
    %c0_i32_0 = arith.constant 0 : i32
    return %arg0, %c0_i32 : i32, i32
  }
}

</mosaic_0001>

<bundles_post_ra>
// kernel: classifier_forward.2
= control target key start
LH: loop header
LB: loop body
LE: loop exit
PB: predicated region body
PF: predicated region fallthrough
CT: control target
= control target key end

     0   :  { %v212_v1 = vmov 0   ;;  %vm79_vm0 = vcmask 261120   ;;  %v29_v9 = vlaneseq  ;;  %s308_s1 = inlined_call_operand.vmem [shape: bf16[32,256], index: 1, kind: input, shape index: {}]   ;;  %s309_s0 = inlined_call_operand.vmem [shape: bf16[64,32], index: 0, kind: input, shape index: {}]   ;;  %s310_s2 = inlined_call_operand.vmem [shape: f32[1,256], index: 2, kind: input, shape index: {}]   ;;  %s311_s3 = inlined_call_operand.vmem [shape: f32[64,256], index: 3, kind: output, shape index: {}]  }
   0x1   :  { %v202_v0 = vld [vmem:[%s308_s1 + $0x4] ss:$8 sps:$4 sm:$0xff]   ;;  %124 = vmatprep.mubr.bf16.mxu0 %v212_v1  ;;  %144 = vmatprep.mubr.bf16.mxu1 %v212_v1  ;;  %v204_v2 = vld [vmem:[%s308_s1] ss:$8 sps:$4 sm:$0xff]   ;;  %v205_v3 = vld [vmem:[%s308_s1 + $0x14] ss:$8 sps:$4 sm:$0xff]  }
   0x2   :  { %92 = vmatprep.subr.bf16.mxu0 %v202_v0  ;;  %197 = vmatprep.subr.bf16.mxu1 %v202_v0  ;;  %v207_v4 = vld [vmem:[%s308_s1 + $0x10] ss:$8 sps:$4 sm:$0xff]   ;;  %v208_v5 = vld [vmem:[%s309_s0] sm:$0xff]   ;;  %v210_v7 = vld [vmem:[%s309_s0 + $0x8] sm:$0xff]   ;;  %v30_v10 = vshrl.u32 %v29_v9, 7 }
   0x3   :  { %93 = vmatpush1.bf16.msra.mxu0 %v204_v2  ;;  %199 = vmatpush1.bf16.msra.mxu1 %v204_v2  ;;  %v209_v6 = vld [vmem:[%s309_s0 + $0x10] sm:$0xff]   ;;  %v211_v8 = vld [vmem:[%s309_s0 + $0x18] sm:$0xff]   ;;  %v27_v12 = vld [vmem:[%s310_s2] sm:$0x3] }
   0x4   :  { %94 = vmatprep.subr.bf16.mxu0 %v205_v3  ;;  %198 = vmatprep.subr.bf16.mxu1 %v205_v3  ;;  %v31_v11 = vsub.s32 0, %v30_v10  ;;  %v35_v13 = vsub.s32 1, %v30_v10 }
   0x6   :  { %v32_v14 = vrot.slane %v27_v12, %v31_v11  ;;  %v36_v15 = vrot.slane %v27_v12, %v35_v13 }
   0x7   :  { %95 = vmatpush1.bf16.msra.mxu0 %v207_v4  ;;  %200 = vmatpush1.bf16.msra.mxu1 %v207_v4 }
   0xa   :  { %193 = vmatmul.mubr.msk.bf16.vlgmr.msra.gmra.mrb[0].mxu0 %vm79_vm0, %v208_v5  ;;  %195 = vmatmul.mubr.msk.bf16.vlgmr.msra.gmra.mrb[0].mxu1 %vm79_vm0, %v209_v6 }
   0xb   :  { %134 = vmatprep.mubr.bf16.mxu0 %v212_v1  ;;  %154 = vmatprep.mubr.bf16.mxu1 %v212_v1 }
  0x12   :  { %194 = vmatmul.mubr.msk.bf16.gmra.mrb[4].mxu0 %vm79_vm0, %v210_v7  ;;  %196 = vmatmul.mubr.msk.bf16.gmra.mrb[4].mxu1 %vm79_vm0, %v211_v8 }
  0xdd   :  { %v126_v16 = vpop.f32.mrb[0].mxu0  ;;  %v146_v17 = vpop.f32.mrb[0].mxu1 }
  0xde   :  { %v127_v18 = vadd.f32 %v126_v16, %v32_v14  ;;  %v147_v19 = vadd.f32 %v146_v17, %v32_v14  ;;  %v128_v20 = vpop.f32.mrb[1].mxu0  ;;  %v148_v21 = vpop.f32.mrb[1].mxu1 }
  0xdf   :  { %v129_v22 = vadd.f32 %v128_v20, %v36_v15  ;;  %v149_v23 = vadd.f32 %v148_v21, %v36_v15  ;;  %v130_v24 = vpop.f32.mrb[2].mxu0  ;;  %v150_v25 = vpop.f32.mrb[2].mxu1 }
  0xe0   :  { %165 = vst [vmem:[%s311_s3] sm:$0xff] %v127_v18  ;;  %173 = vst [vmem:[%s311_s3 + $0x40] sm:$0xff] %v147_v19  ;;  %v131_v26 = vadd.f32 %v130_v24, %v32_v14  ;;  %v151_v27 = vadd.f32 %v150_v25, %v32_v14  ;;  %v132_v28 = vpop.f32.mrb[3].mxu0  ;;  %v152_v29 = vpop.f32.mrb[3].mxu1 }
  0xe1   :  { %166 = vst [vmem:[%s311_s3 + $0x8] sm:$0xff] %v129_v22  ;;  %174 = vst [vmem:[%s311_s3 + $0x48] sm:$0xff] %v149_v23  ;;  %v133_v30 = vadd.f32 %v132_v28, %v36_v15  ;;  %v153_v31 = vadd.f32 %v152_v29, %v36_v15 }
  0xe2   :  { %167 = vst [vmem:[%s311_s3 + $0x10] sm:$0xff] %v131_v26  ;;  %175 = vst [vmem:[%s311_s3 + $0x50] sm:$0xff] %v151_v27 }
  0xe3   :  { %168 = vst [vmem:[%s311_s3 + $0x18] sm:$0xff] %v133_v30  ;;  %176 = vst [vmem:[%s311_s3 + $0x58] sm:$0xff] %v153_v31 }
  0xe5   :  { %v136_v32 = vpop.f32.mrb[4].mxu0  ;;  %v156_v33 = vpop.f32.mrb[4].mxu1 }
  0xe6   :  { %v137_v34 = vadd.f32 %v136_v32, %v32_v14  ;;  %v157_v35 = vadd.f32 %v156_v33, %v32_v14  ;;  %v138_v36 = vpop.f32.mrb[5].mxu0  ;;  %v158_v37 = vpop.f32.mrb[5].mxu1 }
  0xe7   :  { %v139_v38 = vadd.f32 %v138_v36, %v36_v15  ;;  %v159_v39 = vadd.f32 %v158_v37, %v36_v15  ;;  %v140_v40 = vpop.f32.mrb[6].mxu0  ;;  %v160_v41 = vpop.f32.mrb[6].mxu1 }
  0xe8   :  { %169 = vst [vmem:[%s311_s3 + $0x20] sm:$0xff] %v137_v34  ;;  %177 = vst [vmem:[%s311_s3 + $0x60] sm:$0xff] %v157_v35  ;;  %v141_v42 = vadd.f32 %v140_v40, %v32_v14  ;;  %v161_v43 = vadd.f32 %v160_v41, %v32_v14  ;;  %v142_v44 = vpop.f32.mrb[7].mxu0  ;;  %v162_v45 = vpop.f32.mrb[7].mxu1 }
  0xe9   :  { %170 = vst [vmem:[%s311_s3 + $0x28] sm:$0xff] %v139_v38  ;;  %178 = vst [vmem:[%s311_s3 + $0x68] sm:$0xff] %v159_v39  ;;  %v143_v46 = vadd.f32 %v142_v44, %v36_v15  ;;  %v163_v47 = vadd.f32 %v162_v45, %v36_v15 }
  0xea   :  { %171 = vst [vmem:[%s311_s3 + $0x30] sm:$0xff] %v141_v42  ;;  %179 = vst [vmem:[%s311_s3 + $0x70] sm:$0xff] %v161_v43 }
  0xeb   :  { %172 = vst [vmem:[%s311_s3 + $0x38] sm:$0xff] %v143_v46  ;;  %180 = vst [vmem:[%s311_s3 + $0x78] sm:$0xff] %v163_v47 }

// kernel: classifier_forward.3
= control target key start
LH: loop header
LB: loop body
LE: loop exit
PB: predicated region body
PF: predicated region fallthrough
CT: control target
= control target key end

     0   :  { %s1098_s30 = smov 0   ;;  %s1100_s10 = smov 0   ;;  %s1221_s0 = inlined_call_operand.vmem [shape: f32[64,256], index: 0, kind: input, shape index: {}, may-alias: {0,1}]   ;;  %s1222_s1 = inlined_call_operand.vmem [shape: f32[64,256], index: 1, kind: input, shape index: {}, may-alias: {0,1}]   ;;  %s1223_s2 = inlined_call_operand.vmem [shape: bf16[64,256], index: 2, kind: input, shape index: {}]   ;;  %s1224_s3 = inlined_call_operand.vmem [shape: bf16[64,32], index: 3, kind: input, shape index: {}]   ;;  %s1225_s4 = inlined_call_operand.vmem [shape: f32[1,32], index: 4, kind: input, shape index: {}]   ;;  %s1226_s5 = inlined_call_operand.vmem [shape: bf16[32,16], index: 5, kind: input, shape index: {}]   ;;  %s1227_s6 = inlined_call_operand.vmem [shape: f32[1,16], index: 6, kind: input, shape index: {}]   ;;  %s1228_s7 = inlined_call_operand.vmem [shape: bf16[16,128], index: 7, kind: input, shape index: {}]   ;;  %s1229_s8 = inlined_call_operand.vmem [shape: f32[1,128], index: 8, kind: input, shape index: {}]   ;;  %s1230_s9 = inlined_call_operand.vmem [shape: f32[8,128], index: 9, kind: output, shape index: {}]  }
   0x1   :  { %s1102_s11 = smov 0  }
   0x2 LB: > { %s28_s12 = sadd.s32 1, %s1035_s10  ;;  %p873_p0 = scmp.ge.s32.totalorder %s1039_s11, 1  ;;  %s1039_s11 = sphi %s1102_s11, %s19_s11   ;;  %s1035_s10 = sphi %s1100_s10, %s1232_s10   ;;  %s1031_s30 = sphi %s1098_s30, %s1231_s30  }
   0x3   : > { %p29_p1 = scmp.ge.s32.totalorder %s28_s12, 8  ;;  %p322_p2 = scmp.lt.s32.totalorder %s1039_s11, 9 }
   0x5   : > { %s1234_s12 = smov (%p29_p1, %s28_s12), 0  ;;  %p323_p3 = pnand %p873_p0, %p322_p2 }
   0x6   : > { %p367_p4 = scmp.lt.s32.totalorder (!%p323_p3), %s1031_s30, 7  ;;  %s373_s13 = ssub.s32 (!%p323_p3), 7, %s1031_s30 }
   0x7   : > { %326 = sbr.rel (%p323_p3) target bundleno = 1437 (0x59d), region = 56  ;;  %p375_p5 = scmp.lt.s32.totalorder (!%p323_p3), %s373_s13, 7 }
   0x8   : > { %p878_p6 = scmp.ne.s32.totalorder (!%p323_p3), %s1031_s30, 0 }
   0xe   : > { %s368_s14 = scalar_select %p367_p4, %s1031_s30, 7 }
   0xf   : > { %s1236_s13 = smov (!%p375_p5, %s373_s13), 7  ;;  %391 = sbr.rel (%p878_p6) target bundleno = 22 (0x16), region = 60 }
  0x10   : > { %s909_s15 = sshll.u32 %s368_s14, 4  ;;  %s910_s19 = sshll.u32 %s1236_s13, 4  ;;  %vm392_vm0 = vcmask (!%p878_p6), 523264   ;;  %v1041_v0 = vmov (!%p878_p6), 0.0  }
  0x11   : > { %s1124_s18 = scalar_lea.vmem %s1221_s0, %s909_s15  ;;  %s1129_s22 = scalar_lea.vmem %s1222_s1, %s910_s19  ;;  %393 = vst.msk [vmem:[#allocation2] sm:$0xff] (!%p878_p6), %vm392_vm0, %v1041_v0  ;;  %394 = vst.msk [vmem:[#allocation3] sm:$0xff] (!%p878_p6), %vm392_vm0, %v1041_v0 }
  0x12   : > { %395 = vst.msk [vmem:[#allocation4] sm:$0xff] (!%p878_p6), %vm392_vm0, %v1041_v0 }
  0x16 PF: > { %v978_v1 = vld [vmem:[%s1223_s2 + $0x4] ss:$8 sps:$4 sm:$0xff]   ;;  %v980_v2 = vld [vmem:[%s1223_s2] ss:$8 sps:$4 sm:$0xff]   ;;  %v1042_v3 = vmov 0   ;;  %s1043_s16 = smov 32  }
  0x17   : > { %482 = vmatprep.mubr.bf16.mxu0 %v1042_v3  ;;  %450 = vmatprep.subr.bf16.mxu0 %v978_v1  ;;  %v981_v4 = vld [vmem:[%s1223_s2 + $0x14] ss:$8 sps:$4 sm:$0xff]   ;;  %v983_v5 = vld [vmem:[%s1223_s2 + $0x10] ss:$8 sps:$4 sm:$0xff]   ;;  %v984_v6 = vld [vmem:[%s1223_s2 + $0x24] ss:$8 sps:$4 sm:$0xff]  }
  0x18   : > { %451 = vmatpush1.bf16.msra.mxu0 %v980_v2  ;;  %v495_v7 = vld [vmem:[#allocation3] sm:$0xff]  ;;  %v987_v9 = vld [vmem:[%s1223_s2 + $0x34] ss:$8 sps:$4 sm:$0xff]   ;;  %v989_v10 = vld [vmem:[%s1223_s2 + $0x30] ss:$8 sps:$4 sm:$0xff]   ;;  %vm446_vm1 = vcmask 523264  }
  0x19   : > { %452 = vmatprep.subr.bf16.mxu0 %v981_v4  ;;  %504 = vrot.lane.b32.xlu1 %v495_v7, %s1043_s16  ;;  %v986_v8 = vld [vmem:[%s1223_s2 + $0x20] ss:$8 sps:$4 sm:$0xff]   ;;  %s1044_s25 = smov 64   ;;  %vm556_vm2 = vcmask 261120   ;;  %v565_v49 = vld [vmem:[#allocation4] sm:$0xff]  ;;  %p891_p7 = scmp.ne.s32.totalorder %s1031_s30, 7 }
  0x1a   : > { %v396_v11 = vld [vmem:[#allocation2] sm:$0xff]  ;;  %v888_v15 = vld [vmem:[%s1129_s22 + $0x8] sm:$0xff]  ;;  %v1046_v56 = vmov (!%p891_p7), 0.0   ;;  %vm1047_vm3 = vmmov (!%p891_p7), 0   ;;  %v1008_v58 = vld [vmem:[%s1224_s3 + $0x10] sm:$0xff] (!%p891_p7)   ;;  %vm742_vm4 = vcmask (!%p891_p7), 130048  }
  0x1b   : > { %v397_v12 = vpack.c.bf16 %v396_v11, %v396_v11  ;;  %v491_v13 = vld [vmem:[%s1124_s18] sm:$0xff]  ;;  %s1045_s18 = smov 96   ;;  %933 = vmatprep.subr.bf16.mxu1 (!%p891_p7), %v1046_v56  ;;  %v1007_v57 = vld [vmem:[%s1224_s3 + $0x8] sm:$0xff] (!%p891_p7)   ;;  %937 = vmatprep.mubr.msk.bf16.mxu1 (!%p891_p7), %vm1047_vm3, %v1046_v56  ;;  %v1009_v61 = vld [vmem:[%s1224_s3 + $0x18] sm:$0xff] (!%p891_p7)  }
  0x1c   : > { %453 = vmatpush1.bf16.msra.mxu0 %v983_v5  ;;  %v1006_v55 = vld [vmem:[%s1224_s3] sm:$0xff] (!%p891_p7)   ;;  %v1011_v0 = vld [vmem:[%s1226_s5 + $0x8] sm:$0xff] (!%p891_p7)  }
  0x1d   : > { %454 = vmatprep.subr.bf16.mxu0 %v984_v6  ;;  %v1010_v63 = vld [vmem:[%s1226_s5] sm:$0xff] (!%p891_p7)  }
  0x1e   : > { %934 = vmatpush3.bf16.msra.mxu1 (!%p891_p7), %v1010_v63  ;;  %v892_v1 = vld [vmem:[%s1225_s4] ss:$0 sm:$0xff] (!%p891_p7) }
  0x1f   : > { %935 = vmatprep.subr.bf16.mxu1 (!%p891_p7), %v1046_v56 }
  0x20   : > { %455 = vmatpush1.bf16.msra.mxu0 %v986_v8  ;;  %v1012_v8 = vld [vmem:[%s1228_s7] sm:$0xff] (!%p891_p7)  }
  0x21   : > { %456 = vmatprep.subr.bf16.mxu0 %v987_v9 }
  0x22   : > { %936 = vmatpush3.bf16.msra.mxu1 (!%p891_p7), %v1011_v0 }
  0x23   : > { %941 = vmatprep.subr.bf16.mxu1 (!%p891_p7), %v1046_v56 }
  0x24   : > { %457 = vmatpush1.bf16.msra.mxu0 %v989_v10  ;;  %v898_v10 = vld [vmem:[%s1227_s6] ss:$0 sm:$0xff] (!%p891_p7) }
  0x25   : > { %921 = vmatprep.subr.bf16.mxu0 (!%p891_p7), %v1046_v56 }
  0x27   : > { %887 = vmatmul.mubr.msk.bf16.vlgmr.msra.gmra.mrb[0].mxu0 %vm446_vm1, %v397_v12 }
  0x28   : > { %922 = vmatpush3.bf16.msra.mxu0 (!%p891_p7), %v1006_v55  ;;  %929 = vmatprep.mubr.msk.bf16.mxu0 (!%p891_p7), %vm1047_vm3, %v1046_v56 }
  0x29   : > { %923 = vmatprep.subr.bf16.mxu0 (!%p891_p7), %v1046_v56 }
  0x2c   : > { %924 = vmatpush3.bf16.msra.mxu0 (!%p891_p7), %v1007_v57 }
  0x2d   : > { %925 = vmatprep.subr.bf16.mxu0 (!%p891_p7), %v1046_v56 }
  0x30   : > { %926 = vmatpush3.bf16.msra.mxu0 (!%p891_p7), %v1008_v58 }
  0x31   : > { %927 = vmatprep.subr.bf16.mxu0 (!%p891_p7), %v1046_v56 }
  0x34   : > { %928 = vmatpush3.bf16.msra.mxu0 (!%p891_p7), %v1009_v61 }
  0x8b   : > { %v505_v35 = vpop.permute.xlu1 %504 }
  0xfa   : > { %v484_v14 = vpop.f32.mrb[0].mxu0 }
  0xfb   : > { %v492_v16 = vadd.f32 %v491_v13, %v484_v14  ;;  %v486_v17 = vpop.f32.mrb[1].mxu0 }
  0xfc   : > { %v488_v18 = vpop.f32.mrb[2].mxu0  ;;  %v494_v19 = vadd.f32 %v888_v15, %v486_v17 }
  0xfd   : > { %990 = vtanh.f32 %v492_v16  ;;  %v489_v20 = vpop.f32.mrb[3].mxu0  ;;  %v889_v23 = vmul.f32 -1.442695, %v492_v16  ;;  %v902_v18 = vld [vmem:[%s1229_s8] ss:$0 sm:$0xff] (!%p891_p7) }
  0xfe   : > { %992 = vtanh.f32 %v494_v19  ;;  %v890_v24 = vmul.f32 -1.442695, %v494_v19 }
  0xff   : > { %994 = vpow2.f32 %v889_v23 }
 0x100   : > { %996 = vpow2.f32 %v890_v24 }
 0x107   : > { %v991_v21 = vpop.eup %990 }
 0x108   : > { %509 = vrot.lane.b32.xlu0 %v991_v21, %s1044_s25  ;;  %v993_v22 = vpop.eup %992 }
 0x109   : > { %v995_v25 = vpop.eup %994 }
 0x10a   : > { %v499_v26 = vadd.f32 1.0, %v995_v25  ;;  %v997_v27 = vpop.eup %996 }
 0x10b   : > { %v527_v28 = vadd.f32 1.0, %v997_v27 }
 0x10c   : > { %533 = vrot.lane.b32.xlu0 %v993_v22, %s1044_s25  ;;  %998 = vrcp.f32 %v499_v26 }
 0x10d   : > { %1000 = vrcp.f32 %v527_v28 }
 0x116   : > { %v999_v29 = vpop.eup %998 }
 0x117   : > { %v1001_v32 = vpop.eup %1000  ;;  %v507_v36 = vmul.f32 %v999_v29, %v505_v35 }
 0x118   : > { %v531_v39 = vmul.f32 %v1001_v32, %v495_v7 }
 0x17a   : > { %v510_v30 = vpop.permute.xlu0 %509 }
 0x17b   : > { %v512_v31 = vmul.f32 %v999_v29, %v510_v30 }
 0x17d   : > { %514 = vrot.lane.b32.xlu1 %v512_v31, %s1043_s16 }
 0x17e   : > { %v534_v33 = vpop.permute.xlu0 %533 }
 0x17f   : > { %v536_v34 = vmul.f32 %v1001_v32, %v534_v33 }
 0x181   : > { %538 = vrot.lane.b32.xlu0 %v536_v34, %s1043_s16 }
 0x1ef   : > { %v515_v37 = vpop.permute.xlu1 %514 }
 0x1f0   : > { %v517_v38 = vadd.f32 %v515_v37, %v507_v36 }
 0x1f2   : > { %1002 = vtanh.f32 %v517_v38 }
 0x1f3   : > { %v539_v40 = vpop.permute.xlu0 %538 }
 0x1f4   : > { %v541_v41 = vadd.f32 %v539_v40, %v531_v39 }
 0x1f6   : > { %1004 = vtanh.f32 %v541_v41 }
 0x1fc   : > { %v1003_v42 = vpop.eup %1002 }
 0x1fd   : > { %520 = vrot.lane.b32.xlu1 %v1003_v42, %s1044_s25 }
 0x200   : > { %v1005_v43 = vpop.eup %1004 }
 0x201   : > { %544 = vrot.lane.b32.xlu0 %v1005_v43, %s1044_s25 }
 0x26f   : > { %v521_v44 = vpop.permute.xlu1 %520 }
 0x270   : > { %v523_v45 = vmul.f32 %v999_v29, %v521_v44 }
 0x272   : > { %549 = vrot.lane.b32.xlu1 %v523_v45, %s1043_s16 }
 0x273   : > { %v545_v46 = vpop.permute.xlu0 %544 }
 0x274   : > { %v547_v47 = vmul.f32 %v1001_v32, %v545_v46 }
 0x276   : > { %560 = vrot.lane.b32.xlu1 %v517_v38, %s1045_s18  ;;  %553 = vrot.lane.b32.xlu0 %v547_v47, %s1044_s25 }
 0x2e4   : > { %v550_v48 = vpop.permute.xlu1 %549 }
 0x2e6   : > { %571 = sbr.rel (%p891_p7) target bundleno = 1437 (0x59d), region = 64 }
 0x2e8   : > { %v561_v50 = vpop.permute.xlu1 %560  ;;  %v554_v51 = vpop.permute.xlu0 %553 }
 0x2e9   : > { %v563_v52 = vsel %vm556_vm2, %v561_v50, %v541_v41  ;;  %v557_v53 = vsel %vm556_vm2, %v550_v48, %v554_v51 }
 0x2ea   : > { %564 = vst.msk [vmem:[#allocation3] sm:$0xff] %vm446_vm1, %v563_v52  ;;  %558 = vst.msk [vmem:[#allocation2] sm:$0xff] %vm446_vm1, %v557_v53  ;;  %v566_v54 = vadd.f32 %v565_v49, %v557_v53 }
 0x2ec   : > { %567 = vst.msk [vmem:[#allocation4] sm:$0xff] %vm446_vm1, %v566_v54 }
 0x2f3   : > { %v572_v59 = vld [vmem:[#allocation4] sm:$0xff] }
 0x2f4   : > { %v573_v60 = vmul.f32 0.125, %v572_v59 }
 0x2f6   : > { %v574_v62 = vpack.c.bf16 %v573_v60, %v573_v60 }
 0x2f8   : > { %930 = vmatmul.mubr.msk.bf16.vlgmr.msra.gmra.mrb[0].mxu0 %vm446_vm1, %v574_v62 }
 0x3cb   : > { %v651_v2 = vpop.f32.mrb[0].mxu0 }
 0x3cc   : > { %v652_v3 = vadd.f32 %v892_v1, %v651_v2  ;;  %v931_v4 = vpop.f32.mrb[1].mxu0 }
 0x3cd   : > { %v654_v5 = vpop.f32.mrb[2].mxu0 }
 0x3ce   : > { %v657_v6 = vmax.f32 %v652_v3, 0.0  ;;  %v932_v7 = vpop.f32.mrb[3].mxu0 }
 0x3d0   : > { %v658_v9 = vpack.c.bf16 %v657_v6, %v657_v6 }
 0x3d2   : > { %938 = vmatmul.mubr.msk.bf16.vlgmr.msra.gmra.mrb[0].mxu1 %vm556_vm2, %v658_v9 }
 0x3d3   : > { %942 = vmatpush3.bf16.msra.mxu1 %v1012_v8  ;;  %943 = vmatprep.mubr.msk.bf16.mxu1 %vm1047_vm3, %v1046_v56 }
 0x4a5   : > { %v719_v11 = vpop.f32.mrb[0].mxu1 }
 0x4a6   : > { %v720_v12 = vadd.f32 %v898_v10, %v719_v11  ;;  %v939_v13 = vpop.f32.mrb[1].mxu1 }
 0x4a7   : > { %v722_v14 = vpop.f32.mrb[2].mxu1 }
 0x4a8   : > { %v725_v15 = vmax.f32 %v720_v12, 0.0  ;;  %v940_v16 = vpop.f32.mrb[3].mxu1 }
 0x4aa   : > { %v726_v17 = vpack.c.bf16 %v725_v15, %v725_v15 }
 0x4ac   : > { %944 = vmatmul.mubr.msk.bf16.vlgmr.msra.gmra.mrb[4].mxu1 %vm742_vm4, %v726_v17 }
 0x57f   : > { %v780_v19 = vpop.f32.mrb[4].mxu1 }
 0x580   : > { %v781_v20 = vadd.f32 %v902_v18, %v780_v19  ;;  %v945_v21 = vpop.f32.mrb[5].mxu1 }
 0x581   : > { %v783_v22 = vpop.f32.mrb[6].mxu1 }
 0x582   : > { %v905_v23 = vmul.f32 -1.442695, %v781_v20  ;;  %v946_v24 = vpop.f32.mrb[7].mxu1 }
 0x584   : > { %1013 = vpow2.f32 %v905_v23 }
 0x58e   : > { %v1014_v25 = vpop.eup %1013 }
 0x58f   : > { %v789_v26 = vadd.f32 1.0, %v1014_v25 }
 0x591   : > { %1015 = vrcp.f32 %v789_v26 }
 0x59b   : > { %v1016_v27 = vpop.eup %1015 }
 0x59c   : > { %792 = vst [vmem:[%s1230_s9] sm:$0xff] %v1016_v27 }
 0x59d PF: > { %s19_s11 = sadd.s32 1, %s1039_s11   ;;  %s1231_s30 = smov %s1035_s10 }
 0x59e   : > { %p16_p8 = scmp.ge.s32.totalorder %s19_s11, 10   ;;  %s1232_s10 = smov %s1234_s12 }
 0x5a0   :  { %18 = sbr.rel (!%p16_p8) target bundleno = 2 (0x2), region = 97 }

</bundles_post_ra>
